<compile_context>
chip_gen: v5e
topology: v5e:2x2
jax: 0.10.0
libtpu: 0.0.40
codegen_flags: <defaults>
</compile_context>

<pallas_src>
import jax
import jax.numpy as jnp
from jax import lax
from jax.experimental import pallas as pl
from jax.experimental.pallas import tpu as pltpu


def _round_up(x, m):
    return ((x + m - 1) // m) * m


def encoder_kernel(ids_ref, fused_ref, out_ref, acc_ref):
    # ids_ref  : (TB, 1)  int32   -- token ids for this token block
    # fused_ref: (VC, HP) bf16/f32 -- V-chunk of (embedding_table @ W), H lane-padded
    # out_ref  : (TB, HP) f32
    # acc_ref  : (TB, HP) f32 VMEM scratch, resident across the vocab grid axis
    k = pl.program_id(1)

    @pl.when(k == 0)
    def _():
        acc_ref[...] = jnp.zeros_like(acc_ref)

    ids = ids_ref[...]                                           # (TB, 1)
    tb = ids.shape[0]
    vc = fused_ref.shape[0]

    # One-hot selection of this vocab chunk, built directly in the matmul dtype
    # (0/1 is exact in bf16); the gather+projection is a single MXU matmul.
    iota = lax.broadcasted_iota(jnp.int32, (tb, vc), 1) + k * vc  # (TB, VC)
    onehot = (iota == ids).astype(fused_ref.dtype)                # (TB, VC)
    acc_ref[...] += jnp.dot(onehot, fused_ref[...],
                            preferred_element_type=jnp.float32)   # (TB, HP) f32

    @pl.when(k == pl.num_programs(1) - 1)
    def _():
        out_ref[...] = acc_ref[...]


def encoder_forward(sent1_ids, sent2_ids, table, w_t, *,
                    token_block=256, v_block=512,
                    compute_dtype=jnp.bfloat16):
    """sent1_ids: (B, L1) int32, sent2_ids: (B, L2) int32
       table: (V, E) f32 embedding table, w_t: (E, H) f32 (PyTorch weight transposed)
       returns (sent1_linear, sent2_linear) with shapes (B, L1, H), (B, L2, H)."""
    B, L1 = sent1_ids.shape
    B2, L2 = sent2_ids.shape
    assert B == B2
    V, E = table.shape
    H = w_t.shape[1]

    # (1) Fuse the bias-free projection into the embedding table once, outside the
    #     kernel (one-hot selection commutes with the linear map -> exact).
    #     NOTE: re-materialize per weight update if training.
    fused = jnp.dot(table, w_t, precision=lax.Precision.HIGHEST)    # (V, H) f32

    # (2) Lane-dense output: pad H up to a multiple of 128 (unmasked vst).
    hp = _round_up(H, 128)
    # (3) Vocab chunking: bounds the one-hot working set and the fused-table VMEM use.
    vc = min(v_block, _round_up(V, 8))
    vp = _round_up(V, vc)
    fused = jnp.pad(fused, ((0, vp - V), (0, hp - H))).astype(compute_dtype)

    # Flatten both sentences into one token stream (token-wise ops are exact under this).
    ids = jnp.concatenate(
        [sent1_ids.reshape(-1), sent2_ids.reshape(-1)]).astype(jnp.int32)
    n = ids.shape[0]

    # Sublane-aligned token block; keep the (parallel) token grid length >= 2 when
    # there is enough work so v7x's two TensorCores can each take a slice.
    tb = min(token_block, _round_up(n, 8))
    if n > 16 and _round_up(n, tb) // tb < 2:
        tb = max(8, _round_up((n + 1) // 2, 8))
    n_pad = _round_up(n, tb)
    ids2d = jnp.pad(ids, (0, n_pad - n)).reshape(n_pad, 1)

    grid = (n_pad // tb, vp // vc)

    # Explicit VMEM budget from actual (double-buffered) block sizes + headroom.
    itemsize = jnp.dtype(compute_dtype).itemsize
    vmem_bytes = (
        2 * tb * 128 * 4          # ids blocks (lane-padded to 128), double-buffered
        + 2 * vc * hp * itemsize  # fused-table blocks, double-buffered
        + 2 * tb * hp * 4         # output blocks, double-buffered
        + tb * hp * 4             # accumulator scratch
    )
    vmem_limit = int(min(max(2 * vmem_bytes, 8 << 20), 64 << 20))

    cost = pl.CostEstimate(
        flops=2 * n_pad * vp * hp,
        transcendentals=0,
        bytes_accessed=int(n_pad * 4
                           + (n_pad // tb) * vp * hp * itemsize
                           + n_pad * hp * 4),
    )

    out = pl.pallas_call(
        encoder_kernel,
        out_shape=jax.ShapeDtypeStruct((n_pad, hp), jnp.float32),
        grid=grid,
        in_specs=[
            pl.BlockSpec((tb, 1), lambda i, k: (i, 0)),
            pl.BlockSpec((vc, hp), lambda i, k: (k, 0)),
        ],
        out_specs=pl.BlockSpec((tb, hp), lambda i, k: (i, 0)),
        scratch_shapes=[pltpu.VMEM((tb, hp), jnp.float32)],
        compiler_params=pltpu.CompilerParams(
            dimension_semantics=("parallel", "arbitrary"),
            vmem_limit_bytes=vmem_limit),
        cost_estimate=cost,
    )(ids2d, fused)

    out = out[:, :H]
    s1 = out[: B * L1].reshape(B, L1, H)
    s2 = out[B * L1: B * L1 + B * L2].reshape(B, L2, H)
    return s1, s2


def init_params(key, num_embeddings, embedding_size, hidden_size, para_init):
    """Matches encoder.__init__: Embedding default N(0,1), Linear weight N(0, para_init), no bias."""
    k_emb, k_w = jax.random.split(key)
    table = jax.random.normal(
        k_emb, (num_embeddings, embedding_size), jnp.float32)
    # PyTorch stores Linear weight as (H, E); pre-transpose to (E, H) so we do x @ W.
    w = jax.random.normal(
        k_w, (hidden_size, embedding_size), jnp.float32) * para_init
    return table, w.T


if __name__ == "__main__":
    B, L1, L2 = 2, 8, 12
    VOCAB, E, H = 128, 32, 32
    PARA_INIT = 0.01

    key = jax.random.PRNGKey(0)
    k_p, k_s1, k_s2 = jax.random.split(key, 3)
    table, w_t = init_params(k_p, VOCAB, E, H, PARA_INIT)
    sent1 = jax.random.randint(k_s1, (B, L1), 0, VOCAB, dtype=jnp.int32)
    sent2 = jax.random.randint(k_s2, (B, L2), 0, VOCAB, dtype=jnp.int32)

    s1_lin, s2_lin = encoder_forward(sent1, sent2, table, w_t)
    jax.block_until_ready((s1_lin, s2_lin))

    assert s1_lin.shape == (B, L1, H) and s2_lin.shape == (B, L2, H)

    # Pure-JAX reference: embedding lookup + bias-free linear (f32).
    ref1 = jnp.einsum("ble,eh->blh", table[sent1], w_t,
                      precision=lax.Precision.HIGHEST)
    ref2 = jnp.einsum("ble,eh->blh", table[sent2], w_t,
                      precision=lax.Precision.HIGHEST)
    assert bool(jnp.all(jnp.abs(s1_lin - ref1) < 1e-3))
    assert bool(jnp.all(jnp.abs(s2_lin - ref2) < 1e-3))
    print("KERNEL_OK")
</pallas_src>

<mosaic_0001>
module attributes {stable_mosaic.version = 11 : i64} {
  func.func @encoder_kernel(%arg0: i32, %arg1: i32, %arg2: memref<24x1xi32, #tpu.memory_space<vmem>>, %arg3: memref<128x128xbf16, #tpu.memory_space<vmem>>, %arg4: memref<24x128xf32, #tpu.memory_space<vmem>>, %arg5: memref<24x128xf32, #tpu.memory_space<vmem>>) attributes {dimension_semantics = [#tpu.dimension_semantics<parallel>, #tpu.dimension_semantics<arbitrary>], iteration_bounds = array<i64: 2, 1>, scalar_prefetch = 0 : i64, scratch_operands = 1 : i64, tpu.core_type = #tpu.core_type<tc>, window_params = [{transform_indices = @transform_0, window_bounds = array<i64: 24, 1>}, {transform_indices = @transform_1, window_bounds = array<i64: 128, 128>}, {transform_indices = @transform_2, window_bounds = array<i64: 24, 128>}]} {
    %c0_i32 = arith.constant 0 : i32
    %0 = arith.cmpi eq, %arg1, %c0_i32 : i32
    %1 = arith.extui %0 : i1 to i32
    %c0_i32_0 = arith.constant 0 : i32
    %2 = arith.cmpi ne, %1, %c0_i32_0 : i32
    scf.if %2 {
      %cst_10 = arith.constant 0.000000e+00 : f32
      %21 = vector.broadcast %cst_10 : f32 to vector<24x128xf32>
      %c0_11 = arith.constant 0 : index
      %c0_12 = arith.constant 0 : index
      %22 = vector.load %arg5[%c0_11, %c0_12] : memref<24x128xf32, #tpu.memory_space<vmem>>, vector<24x128xf32>
      tpu.vector_store %arg5[%c0_11, %c0_12], %21 {strides = array<i32>} : memref<24x128xf32, #tpu.memory_space<vmem>>, vector<24x128xf32>,
    } else {
    }
    %c0 = arith.constant 0 : index
    %c0_1 = arith.constant 0 : index
    %3 = vector.load %arg2[%c0, %c0_1] : memref<24x1xi32, #tpu.memory_space<vmem>>, vector<24x1xi32>
    %4 = tpu.iota {dimensions = array<i32: 1>} : vector<24x128xi32>
    %c128_i32 = arith.constant 128 : i32
    %5 = arith.muli %arg1, %c128_i32 : i32
    %6 = vector.broadcast %5 : i32 to vector<24x128xi32>
    %7 = arith.addi %4, %6 : vector<24x128xi32>
    %8 = vector.broadcast %3 : vector<24x1xi32> to vector<24x128xi32>
    %9 = arith.cmpi eq, %7, %8 : vector<24x128xi32>
    %10 = arith.extui %9 : vector<24x128xi1> to vector<24x128xi32>
    %11 = arith.sitofp %10 : vector<24x128xi32> to vector<24x128xf32>
    %12 = arith.truncf %11 : vector<24x128xf32> to vector<24x128xbf16>
    %c0_2 = arith.constant 0 : index
    %c0_3 = arith.constant 0 : index
    %13 = vector.load %arg5[%c0_2, %c0_3] : memref<24x128xf32, #tpu.memory_space<vmem>>, vector<24x128xf32>
    %c0_4 = arith.constant 0 : index
    %c0_5 = arith.constant 0 : index
    %14 = vector.load %arg3[%c0_4, %c0_5] : memref<128x128xbf16, #tpu.memory_space<vmem>>, vector<128x128xbf16>
    %cst = arith.constant dense<0.000000e+00> : vector<24x128xf32>
    %15 = tpu.matmul %12, %14, %cst {dimension_numbers = #tpu.dot_dimension_numbers<[1], [0], [0], [1], [0, 0, 1, 1], [], []>} : vector<24x128xbf16>, vector<128x128xbf16>, vector<24x128xf32> -> vector<24x128xf32>
    %16 = arith.addf %13, %15 : vector<24x128xf32>
    %c0_6 = arith.constant 0 : index
    %c0_7 = arith.constant 0 : index
    %17 = vector.load %arg5[%c0_6, %c0_7] : memref<24x128xf32, #tpu.memory_space<vmem>>, vector<24x128xf32>
    tpu.vector_store %arg5[%c0_6, %c0_7], %16 {strides = array<i32>} : memref<24x128xf32, #tpu.memory_space<vmem>>, vector<24x128xf32>,
    %c0_i32_8 = arith.constant 0 : i32
    %18 = arith.cmpi eq, %arg1, %c0_i32_8 : i32
    %19 = arith.extui %18 : i1 to i32
    %c0_i32_9 = arith.constant 0 : i32
    %20 = arith.cmpi ne, %19, %c0_i32_9 : i32
    scf.if %20 {
      %c0_10 = arith.constant 0 : index
      %c0_11 = arith.constant 0 : index
      %21 = vector.load %arg5[%c0_10, %c0_11] : memref<24x128xf32, #tpu.memory_space<vmem>>, vector<24x128xf32>
      %c0_12 = arith.constant 0 : index
      %c0_13 = arith.constant 0 : index
      %22 = vector.load %arg4[%c0_12, %c0_13] : memref<24x128xf32, #tpu.memory_space<vmem>>, vector<24x128xf32>
      tpu.vector_store %arg4[%c0_12, %c0_13], %21 {strides = array<i32>} : memref<24x128xf32, #tpu.memory_space<vmem>>, vector<24x128xf32>,
    } else {
    }
    return
  }
  func.func @transform_0(%arg0: i32, %arg1: i32) -> (i32, i32) {
    %c0_i32 = arith.constant 0 : i32
    %c0_i32_0 = arith.constant 0 : i32
    return %arg0, %c0_i32 : i32, i32
  }
  func.func @transform_1(%arg0: i32, %arg1: i32) -> (i32, i32) {
    %c0_i32 = arith.constant 0 : i32
    %c0_i32_0 = arith.constant 0 : i32
    return %arg1, %c0_i32 : i32, i32
  }
  func.func @transform_2(%arg0: i32, %arg1: i32) -> (i32, i32) {
    %c0_i32 = arith.constant 0 : i32
    %c0_i32_0 = arith.constant 0 : i32
    return %arg0, %c0_i32 : i32, i32
  }
}

</mosaic_0001>

<bundles_post_ra>
// kernel: tpu_custom_call.1
= control target key start
LH: loop header
LB: loop body
LE: loop exit
PB: predicated region body
PF: predicated region fallthrough
CT: control target
= control target key end

     0   :  { %7 = vsyncpa [#allocation4], 0  ;;  %s795_s0 = inlined_call_operand.vmem [shape: s32[48,1], index: 0, kind: input, shape index: {}]   ;;  %s796_s1 = inlined_call_operand.hbm [shape: bf16[128,128], index: 1, kind: input, shape index: {}]   ;;  %s797_s2 = inlined_call_operand.hbm [shape: f32[48,128], index: 2, kind: output, shape index: {}]  }
   0x1   :  { %8 = vsyncpa [#allocation5], 0 }
   0x2   :  { %10 = vsyncpa [#allocation5 + $0x1], 0  ;;  %s696_s9 = smov 0   ;;  %s698_s10 = smov 0  }
   0x3   :  { %s700_s11 = smov 0   ;;  %s702_s12 = smov 0  }
   0x4   :  { %s704_s13 = smov 0   ;;  %s706_s14 = smov 0  }
   0x5 LB: > { %s418_s15 = sadd.s32 4294967295, %s672_s14   ;;  %s419_s16 = sadd.s32 4294967294, %s672_s14   ;;  %s672_s14 = sphi %s706_s14, %s16_s14   ;;  %s668_s13 = sphi %s704_s13, %s804_s13   ;;  %s664_s12 = sphi %s702_s12, %s803_s12   ;;  %s660_s11 = sphi %s700_s11, %s802_s11   ;;  %s656_s10 = sphi %s698_s10, %s801_s10   ;;  %s652_s9 = sphi %s696_s9, %s800_s9  }
   0x6   : > { %s28_s17 = sadd.s32 1, %s668_s13  ;;  %s87_s18 = sadd.s32 1, %s660_s11 }
   0x7   : > { %p30_p0 = scmp.ge.s32.totalorder %s28_s17, 2  ;;  %p97_p1 = scmp.ne.s32.totalorder %s660_s11, %s656_s10 }
   0x8   : > { %p98_p2 = scmp.eq.s32.totalorder %s418_s15, 1  ;;  %p103_p3 = scmp.ne.s32.totalorder %s656_s10, %s652_s9 }
   0x9   : > { %s806_s17 = smov (%p30_p0, %s28_s17), 0  ;;  %p104_p5 = scmp.eq.s32.totalorder %s419_s16, 1 }
   0xa   : > { %p736_p4 = por %p98_p2, %p97_p1  ;;  %s84_s20 = ssub.s32 %s668_s13, %s806_s17 }
   0xb   : > { %p420_p6 = scmp.ge.s32.totalorder %s672_s14, 1  ;;  %p85_p7 = scmp.eq.s32.totalorder %s84_s20, 0 }
   0xc   : > { %p743_p8 = por %p104_p5, %p103_p3  ;;  %p111_p9 = scmp.lt.s32.totalorder %s672_s14, 3 }
   0xd   : > { %s749_s22 = scalar_select %p85_p7, %s660_s11, %s87_s18  }
   0xe   : > { %p112_p10 = pnand %p420_p6, %p111_p9  ;;  %p500_p11 = scmp.eq.s32.totalorder %s418_s15, 0 }
   0xf   : > { %s125_s25 = sshll.u32 %s796_s1, 4  ;;  %s674_s26 = smov [#allocation3]   ;;  %s126_s25 = int_to_ptr.hbm [resolvable:$true] %s125_s25 }
  0x10   : > { %p492_p12 = pneg %p112_p10  ;;  %s127_s27 = sshll.u32 %s674_s26, 4  ;;  %s128_s27 = int_to_ptr.vmem [resolvable:$true] %s127_s27 }
  0x11   : > { %s675_s28 = smov 64   ;;  %s676_s29 = smov 4  }
  0x12   : > { %p493_p13 = pnand %p500_p11, %p492_p12  ;;  %152 = sbr.rel (%p112_p10) target bundleno = 295 (0x127), region = 28 }
  0x14   : > { %495 = dma.hbm_to_vmem [thread:$0]  (!%p493_p13), %s126_s25, 1024, %s128_s27, [#allocation4], %s675_s28, %s675_s28, %s676_s29  }
  0x17   : > { %643 = dma.done.wait (%p500_p11), [#allocation4], 1024  }
  0x18   : > { %645 = vsyncadd (%p500_p11), [#allocation4], 4294966272  ;;  %s175_s30 = smul.u32 3, %s664_s12  ;;  %v677_v0 = vmov 0   ;;  %v475_v1 = vld [vmem:[#allocation3 + $0x38] sm:$0xff]  ;;  %v474_v4 = vld [vmem:[#allocation3 + $0x30] sm:$0xff]  ;;  %v193_v12 = vlaneseq }
  0x19   : > { %558 = vset.pattern.permute.xlu0 %v677_v0  ;;  %559 = vset.pattern.permute.xlu1 %v677_v0  ;;  %v473_v6 = vld [vmem:[#allocation3 + $0x28] sm:$0xff]  ;;  %v472_v7 = vld [vmem:[#allocation3 + $0x20] sm:$0xff]  ;;  %v471_v8 = vld [vmem:[#allocation3 + $0x18] sm:$0xff]  ;;  %v678_v16 = vmov 1.0|1.0   ;;  %s172_s7 = sand.u32 1, %s656_s10  }
  0x1a   : > { %p176_p0 = scmp.lt.s32.totalorder %s175_s30, 5  ;;  %477 = vmatpush.bf16.msra.mxu1 %v475_v1  ;;  %285 = vmatpush.bf16.msra.mxu0 %v475_v1  ;;  %v470_v9 = vld [vmem:[#allocation3 + $0x10] sm:$0xff]  ;;  %v469_v10 = vld [vmem:[#allocation3 + $0x8] sm:$0xff]  ;;  %v468_v11 = vld [vmem:[#allocation3] sm:$0xff]  ;;  %v194_v13 = vand.u32 127, %v193_v12  ;;  %s485_s8 = smul.u32 24, %s172_s7 }
  0x1b   : > { %s476_s16 = smul.u32 24, %s664_s12  ;;  %s319_s26 = scalar_lea.sflag [#allocation5], %s172_s7 }
  0x1c   : > { %s808_s30 = smov (!%p176_p0, %s175_s30), 5  ;;  %s174_s15 = scalar_lea.vmem [#allocation6], %s485_s8 }
  0x1d   : > { %s425_s3 = sshll.u32 %s808_s30, 3  ;;  %s330_s23 = scalar_lea.hbm %s797_s2, %s476_s16 }
  0x1e   : > { %s179_s6 = scalar_lea.vmem %s795_s0, %s425_s3  ;;  %478 = vmatpush.bf16.msra.mxu1 %v474_v4  ;;  %286 = vmatpush.bf16.msra.mxu0 %v474_v4  ;;  %s331_s24 = sshll.u32 %s174_s15, 4  ;;  %s332_s24 = int_to_ptr.vmem [resolvable:$true] %s331_s24 }
  0x1f   : > { %v190_v2 = vld [vmem:[%s179_s6] sm:$0xff]  ;;  %v192_v3 = vld [vmem:[%s179_s6 + $0x10] sm:$0xff]  ;;  %v191_v5 = vld [vmem:[%s179_s6 + $0x8] sm:$0xff]  ;;  %s333_s25 = sshll.u32 %s330_s23, 4  ;;  %s610_s30 = scalar_lea.hbm %s797_s2, 48  ;;  %s334_s25 = int_to_ptr.hbm [resolvable:$true] %s333_s25 }
  0x20   : > { %199 = vperm.xlu0 %558, %v190_v2   ;;  %205 = vperm.xlu1 %559, %v192_v3   ;;  %s604_s27 = sshra.s32 %s334_s25, 4  ;;  %s605_s27 = int_to_ptr.hbm [resolvable:$true] %s604_s27 }
  0x21   : > { %s606_s28 = scalar_lea.hbm %s605_s27, 24  ;;  %p611_p5 = scmp.lt.s32.totalorder %s605_s27, %s797_s2 }
  0x22   : > { %479 = vmatpush.bf16.msra.mxu1 %v473_v6  ;;  %287 = vmatpush.bf16.msra.mxu0 %v473_v6  ;;  %p607_p1 = scmp.ne.s32.totalorder %s605_s27, %s606_s28  ;;  %p612_p6 = scmp.lt.s32.totalorder %s610_s30, %s606_s28 }
  0x24   : > { %p608_p2 = pnand %p607_p1, %p736_p4  ;;  %p613_p7 = por %p612_p6, %p611_p5 }
  0x26   : > { %480 = vmatpush.bf16.msra.mxu1 %v472_v7  ;;  %288 = vmatpush.bf16.msra.mxu0 %v472_v7  ;;  %p609_p3 = pneg %p608_p2 }
  0x28   : > { %202 = vperm.xlu0 %558, %v191_v5   ;;  %p614_p9 = pnand %p613_p7, %p609_p3 }
  0x2a   : > { %481 = vmatpush.bf16.msra.mxu1 %v471_v8  ;;  %289 = vmatpush.bf16.msra.mxu0 %v471_v8 }
  0x2e   : > { %482 = vmatpush.bf16.msra.mxu1 %v470_v9  ;;  %290 = vmatpush.bf16.msra.mxu0 %v470_v9 }
  0x32   : > { %483 = vmatpush.bf16.msra.mxu1 %v469_v10  ;;  %291 = vmatpush.bf16.msra.mxu0 %v469_v10 }
  0x36   : > { %484 = vmatpush.bf16.msra.mxu1 %v468_v11  ;;  %292 = vmatpush.bf16.msra.mxu0 %v468_v11 }
  0x92   : > { %v200_v14 = vpop.permute.xlu0 %199  ;;  %v206_v15 = vpop.permute.xlu1 %205 }
  0x93   : > { %vm209_vm0 = vcmp.eq.s32.totalorder %v194_v13, %v206_v15  ;;  %vm207_vm2 = vcmp.eq.s32.totalorder %v194_v13, %v200_v14 }
  0x94   : > { %vm463_vm1 = vmpackc.low %vm209_vm0, %vm209_vm0 }
  0x95   : > { %464 = vmatmul.msk.bf16.vlgmr.msra.gmra.mxu1 %vm463_vm1, %v678_v16 }
  0x9a   : > { %v203_v17 = vpop.permute.xlu0 %202 }
  0x9b   : > { %vm208_vm3 = vcmp.eq.s32.totalorder %v194_v13, %v203_v17 }
  0x9c   : > { %vm461_vm4 = vmpackc.low %vm208_vm3, %vm207_vm2 }
  0x9d   : > { %462 = vmatmul.msk.bf16.vlgmr.msra.gmra.mxu0 %vm461_vm4, %v678_v16 }
 0x112   : > { %v299_v18 = vpop.f32.mrf.mxu1 }
 0x113   : > { %317 = vst [vmem:[%s174_s15 + $0x10] sm:$0xff] %v299_v18 }
 0x11a   : > { %v294_v19 = vpop.f32.mrf.mxu0  ;;  %v301_v20 = vpop.f32.mrf.mxu1 }
 0x11b   : > { %315 = vst [vmem:[%s174_s15] sm:$0xff] %v294_v19 }
 0x122   : > { %v296_v21 = vpop.f32.mrf.mxu0 }
 0x123   : > { %316 = vst [vmem:[%s174_s15 + $0x8] sm:$0xff] %v296_v21 }
 0x124   : > { %617 = shalt.err (!%p614_p9)
}
 0x125   : > { %s679_s5 = smov 128   ;;  %s680_s6 = smov 8  }
 0x126   : > { %490 = dma.vmem_to_hbm [thread:$0]  (%p736_p4), %s332_s24, 384, %s334_s25, %s319_s26, %s679_s5, %s679_s5, %s680_s6  }
 0x127 PF: > { %p502_p10 = scmp.ge.s32.totalorder %s672_s14, 2  ;;  %s348_s7 = sand.u32 1, %s652_s9  }
 0x128   : > { %s349_s8 = scalar_lea.sflag [#allocation5], %s348_s7 }
 0x129   : > { %p497_p11 = pnand %p502_p10, %p743_p8 }
 0x12b   : > { %p498_p12 = pneg %p497_p11 }
 0x12d   : > { %647 = dma.done.wait (%p498_p12), %s349_s8, 384  }
 0x12e   : > { %649 = vsyncadd (%p498_p12), %s349_s8, 4294966912  ;;  %s16_s14 = sadd.s32 1, %s672_s14   ;;  %s800_s9 = smov %s656_s10 }
 0x12f   : > { %p13_p13 = scmp.ge.s32.totalorder %s16_s14, 4   ;;  %s801_s10 = smov %s660_s11 }
 0x130   : > { %s802_s11 = smov %s749_s22  ;;  %s803_s12 = smov %s668_s13 }
 0x131   : > { %s804_s13 = smov %s806_s17  ;;  %15 = sbr.rel (!%p13_p13) target bundleno = 5 (0x5), region = 77 }
 0x136   :  { %355 = vsyncpa [#allocation4], 1 }
 0x137   :  { %357 = vsyncpa [#allocation4 + $0x1], 1 }
 0x138   :  { %358 = vsyncpa [#allocation5], 1 }
 0x139   :  { %360 = vsyncpa [#allocation5 + $0x1], 1 }

</bundles_post_ra>
